<compile_context>
chip_gen: v7x
topology: tpu7x:2x2x1
jax: 0.10.0
libtpu: 0.0.40
codegen_flags: <defaults>
</compile_context>

<pallas_src>
import jax
import jax.numpy as jnp
from jax.experimental import pallas as pl
from jax.experimental.pallas import tpu as pltpu

STATE_SPACE_SIZE = 8
HIDDEN_SPACE_SIZE = 24
ACTION_SPACE_SIZE = 4
ACTION_PAD = 8  # output rows padded to a full sublane group


def vfa_kernel(x_ref, w1_ref, b1_ref, w2_ref, b2_ref, w3_ref, b3_ref, o_ref):
    # x_ref: (S, bl) with the batch tile on lanes.  bf16 MXU operands,
    # f32 accumulation, f32 bias + ReLU.
    x = x_ref[...].astype(jnp.bfloat16)
    w1 = w1_ref[...].astype(jnp.bfloat16)
    h1 = jnp.dot(w1, x, preferred_element_type=jnp.float32) + b1_ref[...]
    h1 = jnp.maximum(h1, 0.0).astype(jnp.bfloat16)

    w2 = w2_ref[...].astype(jnp.bfloat16)
    h2 = jnp.dot(w2, h1, preferred_element_type=jnp.float32) + b2_ref[...]
    h2 = jnp.maximum(h2, 0.0).astype(jnp.bfloat16)

    w3 = w3_ref[...].astype(jnp.bfloat16)
    out = jnp.dot(w3, h2, preferred_element_type=jnp.float32) + b3_ref[...]
    o_ref[...] = out.astype(o_ref.dtype)


def vfa_forward(x, params, *, bl=16384):
    """x: (B, STATE_SPACE_SIZE) f32. params: PyTorch-convention weights
    (w: (out, in), b: (out,)). Returns (B, ACTION_SPACE_SIZE) f32."""
    B, S = x.shape
    assert S == STATE_SPACE_SIZE
    H, A, AP = HIDDEN_SPACE_SIZE, ACTION_SPACE_SIZE, ACTION_PAD

    # Effective lane tile: big for throughput, but clamped so a small batch
    # doesn't pad out to the full tile.  Must stay a multiple of 128 lanes.
    bl_eff = min(bl, ((B + 127) // 128) * 128)
    bl_eff = max(bl_eff, 128)
    num_tiles = pl.cdiv(B, bl_eff)
    b_pad = num_tiles * bl_eff

    # Lane-dense layout plumbing: batch on the last (lane) axis.
    if b_pad != B:
        x = jnp.pad(x, ((0, b_pad - B), (0, 0)))
    xt = x.T                                               # (S, b_pad)

    # Weights stay in native (out, in) orientation; only tiny (trace-time)
    # reshapes / zero-padding of the last layer to 8 output rows.
    w1, w2, w3 = params["w1"], params["w2"], params["w3"]
    b1 = params["b1"].reshape(H, 1)
    b2 = params["b2"].reshape(H, 1)
    w3p = jnp.pad(w3, ((0, AP - A), (0, 0)))               # (8, H)
    b3p = jnp.pad(params["b3"], (0, AP - A)).reshape(AP, 1)

    flops = 2 * (S * H + H * H + H * AP) * b_pad
    bytes_accessed = 4 * (S * b_pad + AP * b_pad + H * S + H * H + AP * H + 2 * H + AP)
    cost = pl.CostEstimate(flops=flops, bytes_accessed=bytes_accessed, transcendentals=0)

    out_t = pl.pallas_call(
        vfa_kernel,
        out_shape=jax.ShapeDtypeStruct((AP, b_pad), jnp.float32),
        grid_spec=pltpu.PrefetchScalarGridSpec(
            num_scalar_prefetch=0,
            grid=(num_tiles,),
            in_specs=[
                pl.BlockSpec((S, bl_eff), lambda i: (0, i)),   # x tile, lane-dense
                pl.BlockSpec((H, S), lambda i: (0, 0)),        # W1 (whole, constant)
                pl.BlockSpec((H, 1), lambda i: (0, 0)),        # b1
                pl.BlockSpec((H, H), lambda i: (0, 0)),        # W2
                pl.BlockSpec((H, 1), lambda i: (0, 0)),        # b2
                pl.BlockSpec((AP, H), lambda i: (0, 0)),       # W3 (rows padded to 8)
                pl.BlockSpec((AP, 1), lambda i: (0, 0)),       # b3
            ],
            out_specs=pl.BlockSpec((AP, bl_eff), lambda i: (0, i)),
        ),
        compiler_params=pltpu.CompilerParams(
            dimension_semantics=("parallel",),
            vmem_limit_bytes=32 * 1024 * 1024,
        ),
        cost_estimate=cost,
    )(xt, w1, b1, w2, b2, w3p, b3p)

    # Back to PyTorch's (B, A) convention; drop feature/batch padding.
    return out_t[:A, :B].T


def init_params(key):
    """Deterministic init mimicking nn.Linear shapes (PyTorch convention)."""
    ks = jax.random.split(key, 6)

    def lin(kw, kb, fan_in, fan_out):
        bound = 1.0 / jnp.sqrt(fan_in)
        w = jax.random.uniform(kw, (fan_out, fan_in), jnp.float32, -bound, bound)
        b = jax.random.uniform(kb, (fan_out,), jnp.float32, -bound, bound)
        return w, b

    w1, b1 = lin(ks[0], ks[1], STATE_SPACE_SIZE, HIDDEN_SPACE_SIZE)
    w2, b2 = lin(ks[2], ks[3], HIDDEN_SPACE_SIZE, HIDDEN_SPACE_SIZE)
    w3, b3 = lin(ks[4], ks[5], HIDDEN_SPACE_SIZE, ACTION_SPACE_SIZE)
    return {"w1": w1, "b1": b1, "w2": w2, "b2": b2, "w3": w3, "b3": b3}


def vfa_reference(x, p):
    h1 = jnp.maximum(x @ p["w1"].T + p["b1"], 0.0)
    h2 = jnp.maximum(h1 @ p["w2"].T + p["b2"], 0.0)
    return h2 @ p["w3"].T + p["b3"]


if __name__ == "__main__":
    key = jax.random.PRNGKey(0)
    kx, kp = jax.random.split(key)
    B = 16
    x = jax.random.normal(kx, (B, STATE_SPACE_SIZE), jnp.float32)
    params = init_params(kp)

    out = vfa_forward(x, params)
    out = jax.block_until_ready(out)

    ref = vfa_reference(x, params)
    assert out.shape == (B, ACTION_SPACE_SIZE)
    # bf16 MXU operands -> looser tolerance than the pure-f32 variant.
    assert jnp.allclose(out, ref, atol=2e-2, rtol=2e-2), float(
        jnp.max(jnp.abs(out - ref))
    )
    print("KERNEL_OK")
</pallas_src>

<mosaic_0001>
module attributes {stable_mosaic.version = 11 : i64} {
  func.func @vfa_kernel(%arg0: i32, %arg1: memref<8x128xf32, #tpu.memory_space<vmem>>, %arg2: memref<24x8xf32, #tpu.memory_space<vmem>>, %arg3: memref<24x1xf32, #tpu.memory_space<vmem>>, %arg4: memref<24x24xf32, #tpu.memory_space<vmem>>, %arg5: memref<24x1xf32, #tpu.memory_space<vmem>>, %arg6: memref<8x24xf32, #tpu.memory_space<vmem>>, %arg7: memref<8x1xf32, #tpu.memory_space<vmem>>, %arg8: memref<8x128xf32, #tpu.memory_space<vmem>>) attributes {dimension_semantics = [#tpu.dimension_semantics<parallel>], iteration_bounds = array<i64: 1>, scalar_prefetch = 0 : i64, scratch_operands = 0 : i64, tpu.core_type = #tpu.core_type<tc>, window_params = [{transform_indices = @transform_0, window_bounds = array<i64: 8, 128>}, {pipeline_mode = #tpu.pipeline_mode<synchronous>, transform_indices = @transform_1, window_bounds = array<i64: 24, 8>}, {pipeline_mode = #tpu.pipeline_mode<synchronous>, transform_indices = @transform_2, window_bounds = array<i64: 24, 1>}, {pipeline_mode = #tpu.pipeline_mode<synchronous>, transform_indices = @transform_3, window_bounds = array<i64: 24, 24>}, {pipeline_mode = #tpu.pipeline_mode<synchronous>, transform_indices = @transform_4, window_bounds = array<i64: 24, 1>}, {pipeline_mode = #tpu.pipeline_mode<synchronous>, transform_indices = @transform_5, window_bounds = array<i64: 8, 24>}, {pipeline_mode = #tpu.pipeline_mode<synchronous>, transform_indices = @transform_6, window_bounds = array<i64: 8, 1>}, {transform_indices = @transform_7, window_bounds = array<i64: 8, 128>}]} {
    %c0 = arith.constant 0 : index
    %c0_0 = arith.constant 0 : index
    %0 = vector.load %arg1[%c0, %c0_0] : memref<8x128xf32, #tpu.memory_space<vmem>>, vector<8x128xf32>
    %1 = arith.truncf %0 : vector<8x128xf32> to vector<8x128xbf16>
    %c0_1 = arith.constant 0 : index
    %c0_2 = arith.constant 0 : index
    %2 = vector.load %arg2[%c0_1, %c0_2] : memref<24x8xf32, #tpu.memory_space<vmem>>, vector<24x8xf32>
    %3 = arith.truncf %2 : vector<24x8xf32> to vector<24x8xbf16>
    %cst = arith.constant dense<0.000000e+00> : vector<24x128xf32>
    %4 = tpu.matmul %3, %1, %cst {dimension_numbers = #tpu.dot_dimension_numbers<[1], [0], [0], [1], [0, 0, 1, 1], [], []>} : vector<24x8xbf16>, vector<8x128xbf16>, vector<24x128xf32> -> vector<24x128xf32>
    %c0_3 = arith.constant 0 : index
    %c0_4 = arith.constant 0 : index
    %5 = vector.load %arg3[%c0_3, %c0_4] : memref<24x1xf32, #tpu.memory_space<vmem>>, vector<24x1xf32>
    %6 = vector.broadcast %5 : vector<24x1xf32> to vector<24x128xf32>
    %7 = arith.addf %4, %6 : vector<24x128xf32>
    %cst_5 = arith.constant 0.000000e+00 : f32
    %8 = vector.broadcast %cst_5 : f32 to vector<24x128xf32>
    %9 = arith.maximumf %7, %8 : vector<24x128xf32>
    %10 = arith.truncf %9 : vector<24x128xf32> to vector<24x128xbf16>
    %c0_6 = arith.constant 0 : index
    %c0_7 = arith.constant 0 : index
    %11 = vector.load %arg4[%c0_6, %c0_7] : memref<24x24xf32, #tpu.memory_space<vmem>>, vector<24x24xf32>
    %12 = arith.truncf %11 : vector<24x24xf32> to vector<24x24xbf16>
    %cst_8 = arith.constant dense<0.000000e+00> : vector<24x128xf32>
    %13 = tpu.matmul %12, %10, %cst_8 {dimension_numbers = #tpu.dot_dimension_numbers<[1], [0], [0], [1], [0, 0, 1, 1], [], []>} : vector<24x24xbf16>, vector<24x128xbf16>, vector<24x128xf32> -> vector<24x128xf32>
    %c0_9 = arith.constant 0 : index
    %c0_10 = arith.constant 0 : index
    %14 = vector.load %arg5[%c0_9, %c0_10] : memref<24x1xf32, #tpu.memory_space<vmem>>, vector<24x1xf32>
    %15 = vector.broadcast %14 : vector<24x1xf32> to vector<24x128xf32>
    %16 = arith.addf %13, %15 : vector<24x128xf32>
    %cst_11 = arith.constant 0.000000e+00 : f32
    %17 = vector.broadcast %cst_11 : f32 to vector<24x128xf32>
    %18 = arith.maximumf %16, %17 : vector<24x128xf32>
    %19 = arith.truncf %18 : vector<24x128xf32> to vector<24x128xbf16>
    %c0_12 = arith.constant 0 : index
    %c0_13 = arith.constant 0 : index
    %20 = vector.load %arg6[%c0_12, %c0_13] : memref<8x24xf32, #tpu.memory_space<vmem>>, vector<8x24xf32>
    %21 = arith.truncf %20 : vector<8x24xf32> to vector<8x24xbf16>
    %cst_14 = arith.constant dense<0.000000e+00> : vector<8x128xf32>
    %22 = tpu.matmul %21, %19, %cst_14 {dimension_numbers = #tpu.dot_dimension_numbers<[1], [0], [0], [1], [0, 0, 1, 1], [], []>} : vector<8x24xbf16>, vector<24x128xbf16>, vector<8x128xf32> -> vector<8x128xf32>
    %c0_15 = arith.constant 0 : index
    %c0_16 = arith.constant 0 : index
    %23 = vector.load %arg7[%c0_15, %c0_16] : memref<8x1xf32, #tpu.memory_space<vmem>>, vector<8x1xf32>
    %24 = vector.broadcast %23 : vector<8x1xf32> to vector<8x128xf32>
    %25 = arith.addf %22, %24 : vector<8x128xf32>
    %c0_17 = arith.constant 0 : index
    %c0_18 = arith.constant 0 : index
    %26 = vector.load %arg8[%c0_17, %c0_18] : memref<8x128xf32, #tpu.memory_space<vmem>>, vector<8x128xf32>
    tpu.vector_store %arg8[%c0_17, %c0_18], %25 {strides = array<i32>} : memref<8x128xf32, #tpu.memory_space<vmem>>, vector<8x128xf32>,
    return
  }
  func.func @transform_0(%arg0: i32) -> (i32, i32) {
    %c0_i32 = arith.constant 0 : i32
    %c0_i32_0 = arith.constant 0 : i32
    return %c0_i32, %arg0 : i32, i32
  }
  func.func @transform_1(%arg0: i32) -> (i32, i32) {
    %c0_i32 = arith.constant 0 : i32
    %c0_i32_0 = arith.constant 0 : i32
    %c0_i32_1 = arith.constant 0 : i32
    return %c0_i32, %c0_i32_0 : i32, i32
  }
  func.func @transform_2(%arg0: i32) -> (i32, i32) {
    %c0_i32 = arith.constant 0 : i32
    %c0_i32_0 = arith.constant 0 : i32
    %c0_i32_1 = arith.constant 0 : i32
    return %c0_i32, %c0_i32_0 : i32, i32
  }
  func.func @transform_3(%arg0: i32) -> (i32, i32) {
    %c0_i32 = arith.constant 0 : i32
    %c0_i32_0 = arith.constant 0 : i32
    %c0_i32_1 = arith.constant 0 : i32
    return %c0_i32, %c0_i32_0 : i32, i32
  }
  func.func @transform_4(%arg0: i32) -> (i32, i32) {
    %c0_i32 = arith.constant 0 : i32
    %c0_i32_0 = arith.constant 0 : i32
    %c0_i32_1 = arith.constant 0 : i32
    return %c0_i32, %c0_i32_0 : i32, i32
  }
  func.func @transform_5(%arg0: i32) -> (i32, i32) {
    %c0_i32 = arith.constant 0 : i32
    %c0_i32_0 = arith.constant 0 : i32
    %c0_i32_1 = arith.constant 0 : i32
    return %c0_i32, %c0_i32_0 : i32, i32
  }
  func.func @transform_6(%arg0: i32) -> (i32, i32) {
    %c0_i32 = arith.constant 0 : i32
    %c0_i32_0 = arith.constant 0 : i32
    %c0_i32_1 = arith.constant 0 : i32
    return %c0_i32, %c0_i32_0 : i32, i32
  }
  func.func @transform_7(%arg0: i32) -> (i32, i32) {
    %c0_i32 = arith.constant 0 : i32
    %c0_i32_0 = arith.constant 0 : i32
    return %c0_i32, %arg0 : i32, i32
  }
}

</mosaic_0001>

<bundles_post_ra>
// kernel: tpu_custom_call.1
= control target key start
LH: loop header
LB: loop body
LE: loop exit
PB: predicated region body
PF: predicated region fallthrough
CT: control target
= control target key end

     0   :  { %vm60_vm0 = vcmask 1043456   ;;  %vm53_vm1 = vcmask 64512   ;;  %v341_v6 = vmov 0   ;;  %s452_s0 = inlined_call_operand.vmem [shape: f32[8,128], index: 0, kind: input, shape index: {}]   ;;  %s453_s1 = inlined_call_operand.vmem [shape: f32[24,8], index: 1, kind: input, shape index: {}]   ;;  %s454_s2 = inlined_call_operand.vmem [shape: f32[24,1], index: 2, kind: input, shape index: {}]   ;;  %s455_s3 = inlined_call_operand.vmem [shape: f32[24,24], index: 3, kind: input, shape index: {}]   ;;  %s456_s4 = inlined_call_operand.vmem [shape: f32[24,1], index: 4, kind: input, shape index: {}]   ;;  %s457_s5 = inlined_call_operand.vmem [shape: f32[8,24], index: 5, kind: input, shape index: {}]   ;;  %s458_s6 = inlined_call_operand.vmem [shape: f32[8,1], index: 6, kind: input, shape index: {}]   ;;  %s459_s7 = inlined_call_operand.hbm [shape: f32[8,128], index: 7, kind: output, shape index: {}]  }
   0x1   :  { %v28_v0 = vld [vmem:[%s452_s0] sm:$0xff]  ;;  %v31_v2 = vld [vmem:[%s453_s1 + $0x8] sm:$0xff]  ;;  %v32_v5 = vld [vmem:[%s453_s1 + $0x10] sm:$0xff]  ;;  %315 = vset.pattern.permute.xlu0 %v341_v6  ;;  %316 = vset.pattern.permute.xlu1 %v341_v6 }
   0x2   :  { %v30_v1 = vld [vmem:[%s453_s1] sm:$0xff]  ;;  %v29_v3 = vpack.c.bf16 %v28_v0, %v28_v0  ;;  %v37_v8 = vld [vmem:[%s454_s2 + $0x10] sm:$0xff]  ;;  %v34_v10 = vpack.c.bf16 %v32_v5, %v32_v5  ;;  %v36_v11 = vld [vmem:[%s454_s2 + $0x8] sm:$0xff] }
   0x3   :  { %v33_v4 = vpack.c.bf16 %v31_v2, %v30_v1  ;;  %v35_v7 = vld [vmem:[%s454_s2] sm:$0xff] }
   0x4   :  { %40 = vperm.xlu0 %315, %v35_v7   ;;  %309 = vmatprep.subr.msk.bf16.mxu0 %vm60_vm0, %v29_v3  ;;  %v62_v9 = vsel %vm60_vm0, %v29_v3, 0 }
   0x5   :  { %289 = vmatprep.mubr.msk.bf16.mxu0 %vm53_vm1, %v33_v4 }
   0x6   :  { %12 = vsyncpa [#allocation3], 0  ;;  %288 = vmatpush3.bf16.msra.mxu0 %v62_v9  ;;  %50 = vperm.xlu1 %316, %v37_v8   ;;  %v122_v12 = vld [vmem:[%s456_s4] sm:$0xff]  ;;  %v123_v13 = vld [vmem:[%s456_s4 + $0x8] sm:$0xff]  ;;  %vm140_vm2 = vcmask 195584   ;;  %v342_v37 = vmov 0.0  }
   0x7   :  { %v124_v14 = vld [vmem:[%s456_s4 + $0x10] sm:$0xff]  ;;  %v205_v15 = vld [vmem:[%s458_s6] sm:$0xff]  ;;  %v118_v17 = vld [vmem:[%s455_s3 + $0x8] sm:$0xff]  ;;  %301 = vmatprep.subr.bf16.mxu0 %v342_v37  ;;  %vm343_vm3 = vmmov 0   ;;  %s344_s25 = smov [#allocation2]  }
   0x8   :  { %45 = vperm.xlu0 %315, %v36_v11   ;;  %v117_v16 = vld [vmem:[%s455_s3] sm:$0xff]  ;;  %v119_v34 = vld [vmem:[%s455_s3 + $0x10] sm:$0xff]  ;;  %s264_s26 = sshll.u32 %s344_s25, 4  ;;  %s265_s26 = int_to_ptr.vmem [resolvable:$true] %s264_s26 }
   0x9   :  { %290 = vmatmul.mubr.msk.bf16.vlgmr.msra.gmra.mrb[0].mxu0 %vm53_vm1, %v34_v10  ;;  %v120_v18 = vpack.c.bf16 %v118_v17, %v117_v16  ;;  %v121_v36 = vpack.c.bf16 %v119_v34, %v119_v34  ;;  %v203_v53 = vld [vmem:[%s457_s5] sm:$0xff]  ;;  %s317_s27 = scalar_lea.vmem %s265_s26, 128  ;;  %p322_p1 = scmp.lt.s32.totalorder %s265_s26, %s265_s26 }
   0xa   :  { %127 = vperm.xlu1 %316, %v122_v12   ;;  %305 = vmatprep.mubr.msk.bf16.mxu0 %vm343_vm3, %v342_v37  ;;  %v204_v55 = vpack.c.bf16 %v203_v53, %v203_v53  ;;  %p318_p0 = scmp.ne.s32.totalorder %s265_s26, %s317_s27  ;;  %p323_p2 = scmp.lt.s32.totalorder %s317_s27, %s317_s27 }
   0xb   :  { %297 = vmatprep.mubr.msk.bf16.mxu1 %vm140_vm2, %v120_v18 }
   0xc   :  { %132 = vperm.xlu0 %315, %v123_v13   ;;  %p324_p3 = por %p323_p2, %p322_p1 }
   0xe   :  { %137 = vperm.xlu1 %316, %v124_v14   ;;  %p325_p4 = pnand %p324_p3, %p318_p0 }
  0x10   :  { %208 = vperm.xlu0 %315, %v205_v15  }
  0x83   :  { %v41_v19 = vpop.permute.xlu0 %40 }
  0x85   :  { %v51_v20 = vpop.permute.xlu1 %50 }
  0x87   :  { %v46_v26 = vpop.permute.xlu0 %45 }
  0x89   :  { %v128_v38 = vpop.permute.xlu1 %127 }
  0x8b   :  { %v133_v45 = vpop.permute.xlu0 %132 }
  0x8d   :  { %v138_v39 = vpop.permute.xlu1 %137 }
  0x8f   :  { %v209_v56 = vpop.permute.xlu0 %208 }
  0xdc   :  { %v291_v21 = vpop.f32.mrb[0].mxu0 }
  0xdd   :  { %v98_v22 = vpop.f32.mrb[1].mxu0  ;;  %v107_v23 = vadd.f32 %v291_v21, %v51_v20 }
  0xde   :  { %v99_v24 = vadd.f32 %v98_v22, %v41_v19  ;;  %v292_v25 = vpop.f32.mrb[2].mxu0 }
  0xdf   :  { %v101_v27 = vpop.f32.mrb[3].mxu0  ;;  %v114_v29 = vmax.f32 %v107_v23, 0.0 }
  0xe0   :  { %v102_v28 = vadd.f32 %v101_v27, %v46_v26  ;;  %v112_v30 = vmax.f32 %v99_v24, 0.0 }
  0xe1   :  { %v116_v33 = vpack.c.bf16 %v114_v29, %v114_v29 }
  0xe2   :  { %v113_v31 = vmax.f32 %v102_v28, 0.0 }
  0xe3   :  { %v148_v35 = vsel %vm60_vm0, %v116_v33, 0 }
  0xe4   :  { %v115_v32 = vpack.c.bf16 %v113_v31, %v112_v30 }
  0xe6   :  { %293 = vmatprep.subr.bf16.mxu1 %v115_v32 }
  0xe7   :  { %294 = vmatpush3.bf16.msra.mxu1 %v115_v32 }
  0xe8   :  { %310 = vmatprep.subr.msk.bf16.mxu1 %vm60_vm0, %v116_v33 }
  0xeb   :  { %296 = vmatpush3.bf16.msra.mxu1 %v148_v35 }
  0xee   :  { %298 = vmatmul.mubr.msk.bf16.vlgmr.msra.gmra.mrb[0].mxu1 %vm140_vm2, %v121_v36 }
 0x1c1   :  { %v299_v40 = vpop.f32.mrb[0].mxu1 }
 0x1c2   :  { %v193_v41 = vadd.f32 %v299_v40, %v138_v39  ;;  %v184_v42 = vpop.f32.mrb[1].mxu1 }
 0x1c3   :  { %v185_v43 = vadd.f32 %v184_v42, %v128_v38  ;;  %v300_v44 = vpop.f32.mrb[2].mxu1 }
 0x1c4   :  { %v187_v46 = vpop.f32.mrb[3].mxu1  ;;  %v200_v48 = vmax.f32 %v193_v41, 0.0 }
 0x1c5   :  { %v188_v47 = vadd.f32 %v187_v46, %v133_v45  ;;  %v198_v49 = vmax.f32 %v185_v43, 0.0 }
 0x1c6   :  { %v202_v52 = vpack.c.bf16 %v200_v48, %v200_v48 }
 0x1c7   :  { %v199_v50 = vmax.f32 %v188_v47, 0.0 }
 0x1c8   :  { %v215_v54 = vsel %vm60_vm0, %v202_v52, 0 }
 0x1c9   :  { %v201_v51 = vpack.c.bf16 %v199_v50, %v198_v49 }
 0x1cb   :  { %302 = vmatpush3.bf16.msra.mxu0 %v201_v51 }
 0x1cc   :  { %303 = vmatprep.subr.bf16.mxu0 %v342_v37 }
 0x1cf   :  { %304 = vmatpush3.bf16.msra.mxu0 %v215_v54 }
 0x1d2   :  { %306 = vmatmul.mubr.msk.bf16.vlgmr.msra.gmra.mrb[4].mxu0 %vm140_vm2, %v204_v55 }
 0x2a5   :  { %v251_v57 = vpop.f32.mrb[4].mxu0 }
 0x2a6   :  { %v252_v58 = vadd.f32 %v251_v57, %v209_v56  ;;  %v307_v59 = vpop.f32.mrb[5].mxu0 }
 0x2a7   :  { %v254_v60 = vpop.f32.mrb[6].mxu0 }
 0x2a8   :  { %257 = vst [vmem:[#allocation2] sm:$0xff] %v252_v58  ;;  %v308_v61 = vpop.f32.mrb[7].mxu0 }
 0x2a9   :  { %328 = shalt.err (!%p325_p4)
}
 0x2aa   :  { %s329_s29 = scalar_lea.hbm %s459_s7, 128 }
 0x2ab   :  { %p330_p5 = scmp.ne.s32.totalorder %s459_s7, %s329_s29  ;;  %p333_p6 = scmp.lt.u32.totalorder %s329_s29, %s459_s7 }
 0x2ad   :  { %p335_p7 = pnand %p333_p6, %p330_p5 }
 0x2af   :  { %338 = shalt.err (!%p335_p7)
}
 0x2b0   :  { %267 = dma.vmem_to_hbm [thread:$0]  %s265_s26, 128, %s459_s7, [#allocation3]  }
 0x2b1   :  { %339 = dma.done.wait [#allocation3], 128  }
 0x2b2   :  { %340 = vsyncadd [#allocation3], 4294967168 }
 0x2b3   :  { %271 = vsyncpa [#allocation3], 1 }

</bundles_post_ra>
